<compile_context>
chip_gen: v7x
topology: tpu7x:2x2x1
jax: 0.10.0
libtpu: 0.0.40
codegen_flags: <defaults>
</compile_context>

<pallas_src>
import jax
import jax.numpy as jnp
from jax.experimental import pallas as pl
from jax.experimental.pallas import tpu as pltpu


# ------------------------------ kernels -------------------------------------

def ffn_resident_kernel(x_ref, w1_ref, b1_ref, w2_ref, b2_ref, o_ref):
    """Weights fully resident in VMEM; 1-D grid over token tiles."""
    x = x_ref[...].astype(w1_ref.dtype)                      # cast fused in-kernel
    h = jnp.dot(x, w1_ref[...], preferred_element_type=jnp.float32)
    h = jnp.maximum(h + b1_ref[...], 0.0)                    # bias + ReLU in f32
    # TODO(synk): dropout path omitted (module constructed with dropout=0.0).
    out = jnp.dot(h.astype(w2_ref.dtype), w2_ref[...],
                  preferred_element_type=jnp.float32)
    o_ref[...] = (out + b2_ref[...]).astype(o_ref.dtype)


def ffn_chunked_kernel(x_ref, w1_ref, b1_ref, w2_ref, b2_ref, o_ref, acc_ref):
    """d_ff tiled on a reduction grid axis; f32 accumulator persists across k."""
    k = pl.program_id(1)

    @pl.when(k == 0)
    def _init():
        acc_ref[...] = jnp.zeros_like(acc_ref)

    x = x_ref[...].astype(w1_ref.dtype)
    h = jnp.dot(x, w1_ref[...], preferred_element_type=jnp.float32)
    h = jnp.maximum(h + b1_ref[...], 0.0)                    # per-chunk b1 + ReLU
    acc_ref[...] += jnp.dot(h.astype(w2_ref.dtype), w2_ref[...],
                            preferred_element_type=jnp.float32)

    @pl.when(k == pl.num_programs(1) - 1)
    def _finalize():
        o_ref[...] = (acc_ref[...] + b2_ref[...]).astype(o_ref.dtype)


# ------------------------------ helpers -------------------------------------

def _round_up(x, m):
    return ((x + m - 1) // m) * m


def _tpu_defaults():
    """Generation-specific token-tile size and VMEM limit."""
    kind = ""
    try:
        kind = jax.devices()[0].device_kind.lower()
    except Exception:
        pass
    if "v7" in kind:                         # 64 MiB VMEM / TC -> leave headroom
        return {"tm": 512, "vmem_limit_bytes": 56 * 1024 * 1024}
    if "v6" in kind or "trillium" in kind:   # 128 MiB VMEM, crossover ~650 F/B
        return {"tm": 1024, "vmem_limit_bytes": 100 * 1024 * 1024}
    if "v5" in kind:                         # 128 MiB VMEM, crossover ~240 F/B
        return {"tm": 512, "vmem_limit_bytes": 100 * 1024 * 1024}
    # Unknown generation: conservative, v7x-safe settings.
    return {"tm": 512, "vmem_limit_bytes": 56 * 1024 * 1024}


def _resident_vmem_bytes(tm, d_model, d_ff, x_bytes, out_bytes):
    return (2 * 2 * d_model * d_ff * 2        # W1 + W2 bf16 (count 2 bufs, safe)
            + 2 * tm * d_model * x_bytes      # x tile, double-buffered
            + 2 * tm * d_model * out_bytes    # out tile, double-buffered
            + tm * d_ff * 4                   # f32 intermediate h
            + 4 * (d_ff + d_model))           # biases


def _chunked_vmem_bytes(tm, tk, d_model, x_bytes, out_bytes):
    return (2 * 2 * d_model * tk * 2          # W1 + W2 chunks bf16, double-buffered
            + 2 * tm * d_model * x_bytes      # x tile, double-buffered
            + 2 * tm * d_model * out_bytes    # out tile, double-buffered
            + tm * d_model * 4                # f32 accumulator scratch
            + tm * tk * 4                     # f32 intermediate h chunk
            + 4 * (tk + d_model))


# ------------------------------ wrapper -------------------------------------

def positionwise_ffn(x, w1, b1, w2, b2, *, tm=None, tk=None,
                     compute_dtype=jnp.bfloat16, out_dtype=None,
                     vmem_limit_bytes=None, _force_chunked=False):
    """x: (B, S, d_model). w1: (d_model, d_ff), b1: (d_ff,),
    w2: (d_ff, d_model), b2: (d_model,). Returns (B, S, d_model) in out_dtype
    (default: compute_dtype, i.e. bf16)."""
    B, S, d_model = x.shape
    d_ff = w1.shape[1]
    assert w1.shape == (d_model, d_ff)
    assert w2.shape == (d_ff, d_model)

    defaults = _tpu_defaults()
    if tm is None:
        tm = defaults["tm"]
    if vmem_limit_bytes is None:
        vmem_limit_bytes = defaults["vmem_limit_bytes"]
    if out_dtype is None:
        out_dtype = compute_dtype

    M = B * S
    # For small M, cap tm (keeps >=2 token tiles so both TCs / megacore stay busy).
    if M <= tm:
        if M >= 16:
            tm = _round_up(pl.cdiv(M, 2), 8)
        else:
            tm = _round_up(M, 8)
    assert tm % 8 == 0

    x2 = x.reshape(M, d_model)                     # no pad, no dtype pass over x
    w1c = w1.astype(compute_dtype)
    w2c = w2.astype(compute_dtype)
    b1_2 = b1.reshape(1, d_ff).astype(jnp.float32)
    b2_2 = b2.reshape(1, d_model).astype(jnp.float32)

    x_bytes = jnp.dtype(x.dtype).itemsize
    out_bytes = jnp.dtype(out_dtype).itemsize
    budget = int(0.75 * vmem_limit_bytes)          # headroom for Pallas internals

    n_m = pl.cdiv(M, tm)
    out_shape = jax.ShapeDtypeStruct((M, d_model), out_dtype)

    use_resident = (not _force_chunked and
                    _resident_vmem_bytes(tm, d_model, d_ff, x_bytes, out_bytes)
                    <= budget)

    if use_resident:
        out = pl.pallas_call(
            ffn_resident_kernel,
            out_shape=out_shape,
            grid_spec=pltpu.PrefetchScalarGridSpec(
                num_scalar_prefetch=0,
                grid=(n_m,),
                in_specs=[
                    pl.BlockSpec((tm, d_model), lambda i: (i, 0)),   # x tile
                    pl.BlockSpec((d_model, d_ff), lambda i: (0, 0)), # W1 (resident)
                    pl.BlockSpec((1, d_ff), lambda i: (0, 0)),       # b1
                    pl.BlockSpec((d_ff, d_model), lambda i: (0, 0)), # W2 (resident)
                    pl.BlockSpec((1, d_model), lambda i: (0, 0)),    # b2
                ],
                out_specs=pl.BlockSpec((tm, d_model), lambda i: (i, 0)),
            ),
            compiler_params=pltpu.CompilerParams(
                dimension_semantics=("parallel",),
                vmem_limit_bytes=vmem_limit_bytes,
            ),
        )(x2, w1c, b1_2, w2c, b2_2)
    else:
        # Pick the d_ff chunk: prefer >=1024 for low per-step overhead, but
        # shrink until the per-step working set fits the VMEM budget.
        if tk is None:
            cands = [c for c in (2048, 1024, 512, 256, 128)
                     if c <= d_ff and d_ff % c == 0]
            if not cands:
                cands = [d_ff]
            tk = cands[-1]
            for c in cands:
                if _chunked_vmem_bytes(tm, c, d_model, x_bytes, out_bytes) <= budget:
                    tk = c
                    break
        assert d_ff % tk == 0, "tk must divide d_ff (ragged d_ff chunks would " \
                               "contaminate the accumulator)"
        # NOTE: if weight DMA is still exposed after tiling, sweep
        # pipeline_mode=pl.Buffered(3) on the W1/W2 specs.
        out = pl.pallas_call(
            ffn_chunked_kernel,
            out_shape=out_shape,
            grid_spec=pltpu.PrefetchScalarGridSpec(
                num_scalar_prefetch=0,
                grid=(n_m, d_ff // tk),
                in_specs=[
                    pl.BlockSpec((tm, d_model), lambda i, k: (i, 0)),   # x (resident over k)
                    pl.BlockSpec((d_model, tk), lambda i, k: (0, k)),   # W1 chunk
                    pl.BlockSpec((1, tk),       lambda i, k: (0, k)),   # b1 chunk
                    pl.BlockSpec((tk, d_model), lambda i, k: (k, 0)),   # W2 chunk
                    pl.BlockSpec((1, d_model),  lambda i, k: (0, 0)),   # b2
                ],
                out_specs=pl.BlockSpec((tm, d_model), lambda i, k: (i, 0)),
                scratch_shapes=[pltpu.VMEM((tm, d_model), jnp.float32)],
            ),
            compiler_params=pltpu.CompilerParams(
                dimension_semantics=("parallel", "arbitrary"),
                vmem_limit_bytes=vmem_limit_bytes,
            ),
        )(x2, w1c, b1_2, w2c, b2_2)

    return out.reshape(B, S, d_model)


# ------------------------------ test ----------------------------------------

if __name__ == "__main__":
    key = jax.random.PRNGKey(0)
    k_x, k_w1, k_b1, k_w2, k_b2 = jax.random.split(key, 5)

    # Small, lane-dense shapes (d_model / d_ff multiples of 128).
    B, S, d_model, d_ff = 2, 8, 128, 256

    x = jax.random.normal(k_x, (B, S, d_model), dtype=jnp.float32)
    # nn.Linear weights stored pre-transposed: W1 (d_model, d_ff), W2 (d_ff, d_model).
    w1 = jax.random.normal(k_w1, (d_model, d_ff), dtype=jnp.float32) * 0.1
    b1 = jax.random.normal(k_b1, (d_ff,), dtype=jnp.float32) * 0.1
    w2 = jax.random.normal(k_w2, (d_ff, d_model), dtype=jnp.float32) * 0.1
    b2 = jax.random.normal(k_b2, (d_model,), dtype=jnp.float32) * 0.1

    # Reference emulating the kernel numerics (bf16 operands, f32 accumulate).
    f32 = jnp.float32
    xb = x.astype(jnp.bfloat16).astype(f32)
    w1b = w1.astype(jnp.bfloat16).astype(f32)
    w2b = w2.astype(jnp.bfloat16).astype(f32)
    h_ref = jnp.maximum(xb @ w1b + b1, 0.0)
    ref = h_ref.astype(jnp.bfloat16).astype(f32) @ w2b + b2

    # 1) Default path (resident weights, bf16 output).
    out = positionwise_ffn(x, w1, b1, w2, b2)
    jax.block_until_ready(out)
    assert out.shape == (B, S, d_model)
    assert jnp.allclose(out.astype(f32), ref, atol=3e-2, rtol=3e-2), \
        float(jnp.max(jnp.abs(out.astype(f32) - ref)))

    # 2) f32-output variant (tighter check).
    out32 = positionwise_ffn(x, w1, b1, w2, b2, out_dtype=jnp.float32)
    jax.block_until_ready(out32)
    assert jnp.allclose(out32, ref, atol=1e-2, rtol=1e-2), \
        float(jnp.max(jnp.abs(out32 - ref)))

    # 3) Exercise the chunked (d_ff reduction axis) fallback path too.
    out_ck = positionwise_ffn(x, w1, b1, w2, b2, out_dtype=jnp.float32,
                              tk=128, _force_chunked=True)
    jax.block_until_ready(out_ck)
    assert jnp.allclose(out_ck, ref, atol=1e-2, rtol=1e-2), \
        float(jnp.max(jnp.abs(out_ck - ref)))

    # Loose sanity check against the pure-f32 formula.
    ref_f32 = jnp.maximum(x @ w1 + b1, 0.0) @ w2 + b2
    assert jnp.allclose(out32, ref_f32, atol=1.5e-1, rtol=1.5e-1)

    print("KERNEL_OK")
</pallas_src>

<mosaic_0001>
module attributes {stable_mosaic.version = 11 : i64} {
  func.func @ffn_resident_kernel(%arg0: i32, %arg1: memref<8x128xf32, #tpu.memory_space<vmem>>, %arg2: memref<128x256xbf16, #tpu.memory_space<vmem>>, %arg3: memref<1x256xf32, #tpu.memory_space<vmem>>, %arg4: memref<256x128xbf16, #tpu.memory_space<vmem>>, %arg5: memref<1x128xf32, #tpu.memory_space<vmem>>, %arg6: memref<8x128xbf16, #tpu.memory_space<vmem>>) attributes {dimension_semantics = [#tpu.dimension_semantics<parallel>], iteration_bounds = array<i64: 2>, scalar_prefetch = 0 : i64, scratch_operands = 0 : i64, tpu.core_type = #tpu.core_type<tc>, window_params = [{transform_indices = @transform_0, window_bounds = array<i64: 8, 128>}, {pipeline_mode = #tpu.pipeline_mode<synchronous>, transform_indices = @transform_1, window_bounds = array<i64: 128, 256>}, {pipeline_mode = #tpu.pipeline_mode<synchronous>, transform_indices = @transform_2, window_bounds = array<i64: 1, 256>}, {pipeline_mode = #tpu.pipeline_mode<synchronous>, transform_indices = @transform_3, window_bounds = array<i64: 256, 128>}, {pipeline_mode = #tpu.pipeline_mode<synchronous>, transform_indices = @transform_4, window_bounds = array<i64: 1, 128>}, {transform_indices = @transform_5, window_bounds = array<i64: 8, 128>}]} {
    %c0 = arith.constant 0 : index
    %c0_0 = arith.constant 0 : index
    %0 = vector.load %arg1[%c0, %c0_0] : memref<8x128xf32, #tpu.memory_space<vmem>>, vector<8x128xf32>
    %1 = arith.truncf %0 : vector<8x128xf32> to vector<8x128xbf16>
    %c0_1 = arith.constant 0 : index
    %c0_2 = arith.constant 0 : index
    %2 = vector.load %arg2[%c0_1, %c0_2] : memref<128x256xbf16, #tpu.memory_space<vmem>>, vector<128x256xbf16>
    %cst = arith.constant dense<0.000000e+00> : vector<8x256xf32>
    %3 = tpu.matmul %1, %2, %cst {dimension_numbers = #tpu.dot_dimension_numbers<[1], [0], [0], [1], [0, 0, 1, 1], [], []>} : vector<8x128xbf16>, vector<128x256xbf16>, vector<8x256xf32> -> vector<8x256xf32>
    %c0_3 = arith.constant 0 : index
    %c0_4 = arith.constant 0 : index
    %4 = vector.load %arg3[%c0_3, %c0_4] : memref<1x256xf32, #tpu.memory_space<vmem>>, vector<1x256xf32>
    %5 = vector.broadcast %4 : vector<1x256xf32> to vector<8x256xf32>
    %6 = arith.addf %3, %5 : vector<8x256xf32>
    %cst_5 = arith.constant 0.000000e+00 : f32
    %7 = vector.broadcast %cst_5 : f32 to vector<8x256xf32>
    %8 = arith.maximumf %6, %7 : vector<8x256xf32>
    %9 = arith.truncf %8 : vector<8x256xf32> to vector<8x256xbf16>
    %c0_6 = arith.constant 0 : index
    %c0_7 = arith.constant 0 : index
    %10 = vector.load %arg4[%c0_6, %c0_7] : memref<256x128xbf16, #tpu.memory_space<vmem>>, vector<256x128xbf16>
    %cst_8 = arith.constant dense<0.000000e+00> : vector<8x128xf32>
    %11 = tpu.matmul %9, %10, %cst_8 {dimension_numbers = #tpu.dot_dimension_numbers<[1], [0], [0], [1], [0, 0, 1, 1], [], []>} : vector<8x256xbf16>, vector<256x128xbf16>, vector<8x128xf32> -> vector<8x128xf32>
    %c0_9 = arith.constant 0 : index
    %c0_10 = arith.constant 0 : index
    %12 = vector.load %arg5[%c0_9, %c0_10] : memref<1x128xf32, #tpu.memory_space<vmem>>, vector<1x128xf32>
    %13 = vector.broadcast %12 : vector<1x128xf32> to vector<8x128xf32>
    %14 = arith.addf %11, %13 : vector<8x128xf32>
    %15 = arith.truncf %14 : vector<8x128xf32> to vector<8x128xbf16>
    %c0_11 = arith.constant 0 : index
    %c0_12 = arith.constant 0 : index
    %16 = vector.load %arg6[%c0_11, %c0_12] : memref<8x128xbf16, #tpu.memory_space<vmem>>, vector<8x128xbf16>
    tpu.vector_store %arg6[%c0_11, %c0_12], %15 {strides = array<i32>} : memref<8x128xbf16, #tpu.memory_space<vmem>>, vector<8x128xbf16>,
    return
  }
  func.func @transform_0(%arg0: i32) -> (i32, i32) {
    %c0_i32 = arith.constant 0 : i32
    %c0_i32_0 = arith.constant 0 : i32
    return %arg0, %c0_i32 : i32, i32
  }
  func.func @transform_1(%arg0: i32) -> (i32, i32) {
    %c0_i32 = arith.constant 0 : i32
    %c0_i32_0 = arith.constant 0 : i32
    %c0_i32_1 = arith.constant 0 : i32
    return %c0_i32, %c0_i32_0 : i32, i32
  }
  func.func @transform_2(%arg0: i32) -> (i32, i32) {
    %c0_i32 = arith.constant 0 : i32
    %c0_i32_0 = arith.constant 0 : i32
    %c0_i32_1 = arith.constant 0 : i32
    return %c0_i32, %c0_i32_0 : i32, i32
  }
  func.func @transform_3(%arg0: i32) -> (i32, i32) {
    %c0_i32 = arith.constant 0 : i32
    %c0_i32_0 = arith.constant 0 : i32
    %c0_i32_1 = arith.constant 0 : i32
    return %c0_i32, %c0_i32_0 : i32, i32
  }
  func.func @transform_4(%arg0: i32) -> (i32, i32) {
    %c0_i32 = arith.constant 0 : i32
    %c0_i32_0 = arith.constant 0 : i32
    %c0_i32_1 = arith.constant 0 : i32
    return %c0_i32, %c0_i32_0 : i32, i32
  }
  func.func @transform_5(%arg0: i32) -> (i32, i32) {
    %c0_i32 = arith.constant 0 : i32
    %c0_i32_0 = arith.constant 0 : i32
    return %arg0, %c0_i32 : i32, i32
  }
}

</mosaic_0001>

<bundles_post_ra>
// kernel: tpu_custom_call.1
= control target key start
LH: loop header
LB: loop body
LE: loop exit
PB: predicated region body
PF: predicated region fallthrough
CT: control target
= control target key end

     0   :  { %10 = vsyncpa [#allocation3], 0  ;;  %s1324_s0 = inlined_call_operand.hbm [shape: f32[16,128], index: 0, kind: input, shape index: {}]   ;;  %s1325_s1 = inlined_call_operand.hbm [shape: bf16[128,256], index: 1, kind: input, shape index: {}]   ;;  %s1326_s2 = inlined_call_operand.vmem [shape: f32[1,256], index: 2, kind: input, shape index: {}]   ;;  %s1327_s3 = inlined_call_operand.hbm [shape: bf16[256,128], index: 3, kind: input, shape index: {}]   ;;  %s1328_s4 = inlined_call_operand.vmem [shape: f32[1,128], index: 4, kind: input, shape index: {}]   ;;  %s1329_s5 = inlined_call_operand.hbm [shape: bf16[16,128], index: 5, kind: output, shape index: {}]  }
   0x1   :  { %12 = vsyncpa [#allocation3 + $0x1], 0 }
   0x2   :  { %13 = vsyncpa [#allocation6], 0 }
   0x3   :  { %14 = vsyncpa [#allocation4], 0 }
   0x4   :  { %16 = vsyncpa [#allocation4 + $0x1], 0  ;;  %s1085_s18 = smov 0   ;;  %s1087_s19 = smov 0  }
   0x5   :  { %s1089_s20 = smov 0   ;;  %s1091_s21 = smov 0  }
   0x6 LB: > { %s1106_s22 = sadd.s32 4294967295, %s1044_s21   ;;  %s705_s23 = sadd.s32 4294967294, %s1044_s21   ;;  %s1044_s21 = sphi %s1091_s21, %s1349_s21   ;;  %s1040_s20 = sphi %s1089_s20, %s1348_s20   ;;  %s1036_s19 = sphi %s1087_s19, %s1347_s19   ;;  %s1032_s18 = sphi %s1085_s18, %s1346_s18  }
   0x7   : > { %p42_p0 = scmp.ne.s32.totalorder %s1036_s19, %s1032_s18  ;;  %p1330_p1 = scmp.eq.s32.totalorder %s1106_s22, 0 }
   0x8   : > { %p156_p3 = scmp.eq.s32.totalorder %s705_s23, 1  ;;  %p706_p5 = scmp.ge.s32.totalorder %s1044_s21, 1 }
   0x9   : > { %p1115_p4 = por %p1330_p1, %p42_p0  ;;  %p163_p7 = scmp.lt.s32.totalorder %s1044_s21, 3 }
   0xa   : > { %p1120_p6 = por %p156_p3, %p42_p0  ;;  %s1046_s27 = smov [#allocation5]  }
   0xb   : > { %s1333_s24 = scalar_select %p1115_p4, 1, 0 }
   0xc   : > { %s1334_s25 = scalar_select %p1120_p6, 1, 0 }
   0xd   : > { %p1125_p8 = pnand %p706_p5, %p163_p7  ;;  %s175_s28 = sshll.u32 %s1046_s27, 4  ;;  %s1129_s28 = int_to_ptr.vmem [resolvable:$true] %s175_s28 }
   0xe   : > { %s1047_s30 = smov [#allocation7]   ;;  %s888_s9 = scalar_lea.hbm %s1325_s1, 2048 }
   0xf   : > { %p788_p9 = pneg %p1125_p8  ;;  %s191_s6 = sshll.u32 %s1047_s30, 4  ;;  %s1140_s6 = int_to_ptr.vmem [resolvable:$true] %s191_s6 }
  0x10   : > { %p889_p12 = scmp.ne.s32.totalorder %s1325_s1, %s888_s9  ;;  %p895_p5 = scmp.lt.u32.totalorder %s888_s9, %s1325_s1 }
  0x11   : > { %p1136_p11 = pnand %p788_p9, %p1330_p1 }
  0x13   : > { %p890_p13 = pneg %p1136_p11 }
  0x15   : > { %p891_p0 = pnand %p890_p13, %p889_p12 }
  0x17   : > { %p892_p3 = pneg %p891_p0 }
  0x19   : > { %p897_p7 = pnand %p895_p5, %p892_p3 }
  0x1b   : > { %900 = shalt.err (!%p897_p7)
}
  0x1c   : > { %s901_s14 = scalar_lea.vmem %s1129_s28, 2048  ;;  %p909_p2 = scmp.lt.s32.totalorder %s1129_s28, %s1129_s28 }
  0x1d   : > { %p902_p9 = scmp.ne.s32.totalorder %s1129_s28, %s901_s14  ;;  %p910_p12 = scmp.lt.s32.totalorder %s901_s14, %s901_s14 }
  0x1f   : > { %p904_p10 = pnand %p902_p9, %p890_p13  ;;  %p911_p0 = por %p910_p12, %p909_p2 }
  0x21   : > { %p905_p1 = pneg %p904_p10 }
  0x23   : > { %p912_p6 = pnand %p911_p0, %p905_p1 }
  0x25   : > { %915 = shalt.err (!%p912_p6)
}
  0x26   : > { %s1048_s15 = smov 128   ;;  %s1049_s16 = smov 8  }
  0x27   : > { %791 = dma.hbm_to_vmem [thread:$0]  (!%p1136_p11), %s1325_s1, 2048, %s1129_s28, [#allocation6], %s1048_s15, %s1048_s15, %s1049_s16  }
  0x28   : > { %s916_s7 = scalar_lea.hbm %s1327_s3, 2048 }
  0x29   : > { %p917_p2 = scmp.ne.s32.totalorder %s1327_s3, %s916_s7  ;;  %p923_p10 = scmp.lt.u32.totalorder %s916_s7, %s1327_s3 }
  0x2b   : > { %p919_p1 = pnand %p917_p2, %p890_p13 }
  0x2d   : > { %p920_p6 = pneg %p919_p1 }
  0x2f   : > { %p925_p3 = pnand %p923_p10, %p920_p6 }
  0x31   : > { %928 = shalt.err (!%p925_p3)
}
  0x32   : > { %s929_s28 = scalar_lea.vmem %s1140_s6, 2048  ;;  %p937_p12 = scmp.lt.s32.totalorder %s1140_s6, %s1140_s6 }
  0x33   : > { %p930_p5 = scmp.ne.s32.totalorder %s1140_s6, %s929_s28  ;;  %p938_p0 = scmp.lt.s32.totalorder %s929_s28, %s929_s28 }
  0x35   : > { %p932_p7 = pnand %p930_p5, %p890_p13  ;;  %p939_p2 = por %p938_p0, %p937_p12 }
  0x37   : > { %p933_p9 = pneg %p932_p7 }
  0x39   : > { %p940_p1 = pnand %p939_p2, %p933_p9 }
  0x3b   : > { %943 = shalt.err (!%p940_p1)
}
  0x3c   : > { %s1050_s12 = smov 64   ;;  %s1051_s13 = smov 4  }
  0x3d   : > { %794 = dma.hbm_to_vmem [thread:$0]  (!%p1136_p11), %s1327_s3, 2048, %s1140_s6, [#allocation6], %s1050_s12, %s1050_s12, %s1051_s13  }
  0x3e   : > { %s1195_s16 = sadd.s32 1, %s1044_s21   ;;  %s29_s23 = sadd.s32 1, %s1040_s20 }
  0x3f   : > { %s26_s17 = ssub.s32 %s1044_s21, %s1195_s16  ;;  %p36_p6 = scmp.ne.s32.totalorder %s1040_s20, %s1036_s19 }
  0x40   : > { %p27_p13 = scmp.eq.s32.totalorder %s26_s17, 0  ;;  %p37_p10 = scmp.eq.s32.totalorder %s1044_s21, 0 }
  0x41   : > { %p1337_p5 = scmp.eq.s32.totalorder %s1106_s22, 1  ;;  %p805_p9 = scmp.lt.s32.totalorder %s1044_s21, 2 }
  0x42   : > { %s1204_s27 = scalar_select %p27_p13, %s1040_s20, %s29_s23  }
  0x43   : > { %p38_p3 = por %p37_p10, %p36_p6  ;;  %p1208_p7 = por %p1337_p5, %p36_p6 }
  0x44   : > { %s208_s29 = sand.u32 1, %s1040_s20   ;;  %s711_s6 = sshll.u32 %s1044_s21, 7 }
  0x45   : > { %s1338_s30 = scalar_select %p1208_p7, 1, 0 }
  0x46   : > { %s710_s7 = sshll.u32 %s208_s29, 3  ;;  %s1218_s10 = scalar_lea.hbm %s1324_s0, %s711_s6 }
  0x47   : > { %s212_s11 = scalar_lea.vmem [#allocation2], %s710_s7  ;;  %p1222_p11 = pnand %p805_p9, %p38_p3 }
  0x48   : > { %s219_s28 = sshll.u32 %s212_s11, 4  ;;  %s209_s13 = scalar_lea.sflag [#allocation3], %s208_s29  ;;  %s1220_s28 = int_to_ptr.vmem [resolvable:$true] %s219_s28 }
  0x49   : > { %s944_s14 = scalar_lea.hbm %s1218_s10, 128  ;;  %p946_p0 = pneg %p1222_p11 }
  0x4a   : > { %p945_p12 = scmp.ne.s32.totalorder %s1218_s10, %s944_s14  ;;  %s949_s23 = scalar_lea.hbm %s1324_s0, 256 }
  0x4b   : > { %p950_p13 = scmp.lt.u32.totalorder %s1218_s10, %s1324_s0  ;;  %p951_p6 = scmp.lt.u32.totalorder %s949_s23, %s944_s14 }
  0x4c   : > { %p947_p2 = pnand %p946_p0, %p945_p12  ;;  %p953_p3 = scmp.lt.u32.totalorder %s944_s14, %s1218_s10 }
  0x4d   : > { %p952_p10 = por %p951_p6, %p950_p13 }
  0x4e   : > { %p948_p1 = pneg %p947_p2 }
  0x4f   : > { %p954_p5 = por %p953_p3, %p952_p10 }
  0x51   : > { %p955_p9 = pnand %p954_p5, %p948_p1 }
  0x53   : > { %958 = shalt.err (!%p955_p9)
}
  0x54   : > { %s959_s29 = scalar_lea.vmem %s1220_s28, 128  ;;  %s1052_s8 = smov [#allocation2]  }
  0x55   : > { %p960_p12 = scmp.ne.s32.totalorder %s1220_s28, %s959_s29  ;;  %s964_s9 = sshll.u32 %s1052_s8, 4  ;;  %s965_s9 = int_to_ptr.vmem [resolvable:$false] %s964_s9 }
  0x56   : > { %s966_s11 = scalar_lea.vmem %s965_s9, 256  ;;  %p967_p4 = scmp.lt.s32.totalorder %s1220_s28, %s965_s9 }
  0x57   : > { %p962_p2 = pnand %p960_p12, %p946_p0  ;;  %p968_p13 = scmp.lt.s32.totalorder %s966_s11, %s959_s29 }
  0x59   : > { %p963_p7 = pneg %p962_p2  ;;  %p969_p6 = por %p968_p13, %p967_p4 }
  0x5b   : > { %p970_p10 = pnand %p969_p6, %p963_p7 }
  0x5d   : > { %973 = shalt.err (!%p970_p10)
}
  0x5e   : > { %798 = dma.hbm_to_vmem [thread:$0]  (!%p1222_p11), %s1218_s10, 128, %s1220_s28, %s209_s13  }
  0x5f   : > { %228 = sbr.rel (%p1125_p8) target bundleno = 592 (0x250), region = 40  ;;  %s1254_s14 = sand.u32 (!%p1125_p8), 1, %s1036_s19  }
  0x60   : > { %s713_s15 = sshll.u32 (!%p1125_p8), %s1254_s14, 3  ;;  %s231_s17 = scalar_lea.sflag (!%p1125_p8), [#allocation3], %s1254_s14 }
  0x61   : > { %s1258_s23 = scalar_lea.vmem (!%p1125_p8), [#allocation2], %s713_s15  ;;  %p1340_p4 = scmp.ne.s32.totalorder (!%p1125_p8), %s1333_s24, 0 }
  0x66   : > { %1019 = dma.done.wait (%p1340_p4), %s231_s17, 128  }
  0x67   : > { %1021 = vsyncadd (%p1340_p4), %s231_s17, 4294967168  ;;  %p1341_p7 = scmp.eq.s32.totalorder %s1106_s22, 0 }
  0x69   : > { %1023 = dma.done.wait (%p1341_p7), [#allocation6], 4096   ;;  %p1342_p8 = pmov %p1341_p7 }
  0x6a   : > { %v1053_v0 = vmov 0   ;;  %v848_v1 = vld [vmem:[#allocation5 + $0x4] ss:$8 sps:$4 sm:$0xff]   ;;  %v850_v2 = vld [vmem:[#allocation5] ss:$8 sps:$4 sm:$0xff]   ;;  %v876_v15 = vld [vmem:[#allocation7 + $0x50] sm:$0xff]   ;;  %v290_v35 = vlaneseq }
  0x6b   : > { %1025 = vsyncadd (%p1342_p8), [#allocation6], 4294963200  ;;  %412 = vmatprep.mubr.bf16.mxu0 %v1053_v0  ;;  %380 = vmatprep.subr.bf16.mxu0 %v848_v1  ;;  %v851_v3 = vld [vmem:[#allocation5 + $0x14] ss:$8 sps:$4 sm:$0xff]   ;;  %v853_v4 = vld [vmem:[#allocation5 + $0x10] ss:$8 sps:$4 sm:$0xff]  }
  0x6c   : > { %381 = vmatpush1.bf16.msra.mxu0 %v850_v2  ;;  %v854_v5 = vld [vmem:[#allocation5 + $0x24] ss:$8 sps:$4 sm:$0xff]   ;;  %v856_v6 = vld [vmem:[#allocation5 + $0x20] ss:$8 sps:$4 sm:$0xff]   ;;  %v857_v7 = vld [vmem:[#allocation5 + $0x34] ss:$8 sps:$4 sm:$0xff]  }
  0x6d   : > { %382 = vmatprep.subr.bf16.mxu0 %v851_v3  ;;  %v859_v8 = vld [vmem:[#allocation5 + $0x30] ss:$8 sps:$4 sm:$0xff]   ;;  %v860_v9 = vld [vmem:[#allocation5 + $0x44] ss:$8 sps:$4 sm:$0xff]   ;;  %v862_v12 = vld [vmem:[#allocation5 + $0x40] ss:$8 sps:$4 sm:$0xff]  }
  0x6e   : > { %v872_v10 = vld [vmem:[#allocation7 + $0x40] sm:$0xff]   ;;  %v874_v13 = vld [vmem:[#allocation7 + $0x48] sm:$0xff]   ;;  %v863_v16 = vld [vmem:[#allocation5 + $0x54] ss:$8 sps:$4 sm:$0xff]   ;;  %v291_v36 = vshrl.u32 %v290_v35, 7  ;;  %s716_s10 = sshll.u32 %s1254_s14, 2 }
  0x6f   : > { %v873_v11 = vld [vmem:[#allocation7] sm:$0xff]   ;;  %754 = vmatprep.subr.bf16.mxu1 %v872_v10  ;;  %v875_v14 = vld [vmem:[#allocation7 + $0x8] sm:$0xff]   ;;  %v865_v17 = vld [vmem:[#allocation5 + $0x50] ss:$8 sps:$4 sm:$0xff]   ;;  %s751_s13 = sshll.u32 %s1106_s22, 6  ;;  %s268_s7 = scalar_lea.vmem [#allocation8], %s716_s10 }
  0x70   : > { %383 = vmatpush1.bf16.msra.mxu0 %v853_v4  ;;  %755 = vmatpush3.bf16.msra.mxu1 %v873_v11  ;;  %v877_v18 = vld [vmem:[#allocation7 + $0x10] sm:$0xff]   ;;  %v878_v19 = vld [vmem:[#allocation7 + $0x58] sm:$0xff]   ;;  %v866_v20 = vld [vmem:[#allocation5 + $0x64] ss:$8 sps:$4 sm:$0xff]   ;;  %v292_v37 = vsub.s32 0, %v291_v36  ;;  %v296_v39 = vsub.s32 1, %v291_v36  ;;  %s1280_s9 = scalar_lea.hbm %s1329_s5, %s751_s13 }
  0x71   : > { %384 = vmatprep.subr.bf16.mxu0 %v854_v5  ;;  %756 = vmatprep.subr.bf16.mxu1 %v874_v13  ;;  %v868_v21 = vld [vmem:[#allocation5 + $0x60] ss:$8 sps:$4 sm:$0xff]   ;;  %v869_v22 = vld [vmem:[#allocation5 + $0x74] ss:$8 sps:$4 sm:$0xff]   ;;  %v871_v26 = vld [vmem:[#allocation5 + $0x70] ss:$8 sps:$4 sm:$0xff]  }
  0x72   : > { %v879_v23 = vld [vmem:[#allocation7 + $0x18] sm:$0xff]   ;;  %v880_v24 = vld [vmem:[#allocation7 + $0x60] sm:$0xff]   ;;  %v882_v28 = vld [vmem:[#allocation7 + $0x68] sm:$0xff]   ;;  %s616_s6 = sshll.u32 %s268_s7, 4  ;;  %s603_s11 = scalar_lea.sflag [#allocation4], %s1254_s14  ;;  %s1282_s6 = int_to_ptr.vmem [resolvable:$true] %s616_s6 }
  0x73   : > { %v881_v25 = vld [vmem:[#allocation7 + $0x20] sm:$0xff]   ;;  %v270_v27 = vld [vmem:[%s1258_s23] sm:$0xff]  ;;  %v883_v30 = vld [vmem:[#allocation7 + $0x28] sm:$0xff]   ;;  %s974_s15 = scalar_lea.vmem %s1282_s6, 64  ;;  %p1343_p0 = scmp.ne.s32.totalorder %s1338_s30, 0 }
  0x74   : > { %385 = vmatpush1.bf16.msra.mxu0 %v856_v6  ;;  %757 = vmatpush3.bf16.msra.mxu1 %v875_v14  ;;  %v271_v29 = vpack.c.bf16 %v270_v27, %v270_v27  ;;  %v884_v31 = vld [vmem:[#allocation7 + $0x70] sm:$0xff]   ;;  %v886_v33 = vld [vmem:[#allocation7 + $0x78] sm:$0xff]   ;;  %p975_p11 = scmp.ne.s32.totalorder %s1282_s6, %s974_s15  ;;  %s1054_s22 = smov [#allocation8]  }
  0x75   : > { %386 = vmatprep.subr.bf16.mxu0 %v857_v7  ;;  %758 = vmatprep.subr.bf16.mxu1 %v876_v15  ;;  %v885_v32 = vld [vmem:[#allocation7 + $0x30] sm:$0xff]   ;;  %v887_v34 = vld [vmem:[#allocation7 + $0x38] sm:$0xff]   ;;  %s978_s17 = sshll.u32 %s1054_s22, 4  ;;  %s979_s17 = int_to_ptr.vmem [resolvable:$false] %s978_s17 }
  0x76   : > { %v288_v38 = vld [vmem:[%s1326_s2] sm:$0x3]  ;;  %p976_p1 = pnand %p975_p11, %p1343_p0  ;;  %s980_s23 = scalar_lea.vmem %s979_s17, 128 }
  0x77   : > { %v293_v40 = vrot.slane %v288_v38, %v292_v37  ;;  %v297_v41 = vrot.slane %v288_v38, %v296_v39  ;;  %v733_v53 = vld [vmem:[%s1328_s4] ss:$0 sm:$0xff]  ;;  %p981_p5 = scmp.lt.s32.totalorder %s1282_s6, %s979_s17  ;;  %p982_p9 = scmp.lt.s32.totalorder %s980_s23, %s974_s15 }
  0x78   : > { %387 = vmatpush1.bf16.msra.mxu0 %v859_v8  ;;  %759 = vmatpush3.bf16.msra.mxu1 %v877_v18  ;;  %p977_p3 = pneg %p976_p1 }
  0x79   : > { %388 = vmatprep.subr.bf16.mxu0 %v860_v9  ;;  %760 = vmatprep.subr.bf16.mxu1 %v878_v19  ;;  %p983_p12 = por %p982_p9, %p981_p5 }
  0x7b   : > { %p984_p2 = pnand %p983_p12, %p977_p3 }
  0x7c   : > { %389 = vmatpush1.bf16.msra.mxu0 %v862_v12  ;;  %761 = vmatpush3.bf16.msra.mxu1 %v879_v23 }
  0x7d   : > { %390 = vmatprep.subr.bf16.mxu0 %v863_v16  ;;  %762 = vmatprep.subr.bf16.mxu1 %v880_v24 }
  0x80   : > { %391 = vmatpush1.bf16.msra.mxu0 %v865_v17  ;;  %763 = vmatpush3.bf16.msra.mxu1 %v881_v25 }
  0x81   : > { %392 = vmatprep.subr.bf16.mxu0 %v866_v20  ;;  %764 = vmatprep.subr.bf16.mxu1 %v882_v28 }
  0x84   : > { %393 = vmatpush1.bf16.msra.mxu0 %v868_v21  ;;  %765 = vmatpush3.bf16.msra.mxu1 %v883_v30 }
  0x85   : > { %394 = vmatprep.subr.bf16.mxu0 %v869_v22  ;;  %766 = vmatprep.subr.bf16.mxu1 %v884_v31 }
  0x88   : > { %395 = vmatpush1.bf16.msra.mxu0 %v871_v26  ;;  %767 = vmatpush3.bf16.msra.mxu1 %v885_v32 }
  0x89   : > { %768 = vmatprep.subr.bf16.mxu1 %v886_v33 }
  0x8b   : > { %413 = vmatmul.mubr.bf16.vlgmr.msra.gmra.mrb[0].mxu0 %v271_v29 }
  0x8c   : > { %769 = vmatpush3.bf16.msra.mxu1 %v887_v34 }
 0x15e   : > { %v414_v42 = vpop.f32.mrb[0].mxu0 }
 0x15f   : > { %v415_v43 = vadd.f32 %v414_v42, %v293_v40  ;;  %v416_v44 = vpop.f32.mrb[1].mxu0 }
 0x160   : > { %v417_v45 = vadd.f32 %v416_v44, %v297_v41  ;;  %v418_v46 = vpop.f32.mrb[2].mxu0 }
 0x161   : > { %v421_v47 = vmax.f32 %v415_v43, 0.0  ;;  %v419_v48 = vpop.f32.mrb[3].mxu0 }
 0x162   : > { %v422_v49 = vmax.f32 %v417_v45, 0.0 }
 0x163   : > { %v423_v51 = vpack.c.bf16 %v421_v47, %v421_v47 }
 0x164   : > { %v424_v50 = vpack.c.bf16 %v422_v49, %v422_v49 }
 0x166   : > { %592 = vmatprep.mubr.bf16.mxu1 %v424_v50 }
 0x167   : > { %593 = vmatmul.mubr.bf16.vlgmr.msra.gmra.mrb[0].mxu1 %v423_v51 }
 0x23a   : > { %v770_v52 = vpop.f32.mrb[0].mxu1 }
 0x23b   : > { %v771_v54 = vpop.f32.mrb[1].mxu1 }
 0x23c   : > { %v772_v55 = vadd.f32 %v771_v54, %v770_v52  ;;  %v773_v56 = vpop.f32.mrb[2].mxu1 }
 0x23d   : > { %v774_v57 = vpop.f32.mrb[3].mxu1 }
 0x23e   : > { %v595_v58 = vadd.f32 %v772_v55, %v733_v53 }
 0x240   : > { %v600_v59 = vpack.c.bf16 %v595_v58, %v595_v58 }
 0x242   : > { %601 = vst [vmem:[%s268_s7] sm:$0xf] %v600_v59 }
 0x243   : > { %987 = shalt.err (!%p984_p2)
}
 0x244   : > { %s988_s14 = scalar_lea.hbm %s1280_s9, 64  ;;  %s992_s10 = scalar_lea.hbm %s1329_s5, 128 }
 0x245   : > { %p989_p13 = scmp.ne.s32.totalorder %s1280_s9, %s988_s14  ;;  %p993_p4 = scmp.lt.u32.totalorder %s1280_s9, %s1329_s5 }
 0x246   : > { %p994_p7 = scmp.lt.u32.totalorder %s992_s10, %s988_s14  ;;  %p996_p11 = scmp.lt.u32.totalorder %s988_s14, %s1280_s9 }
 0x247   : > { %p990_p6 = pnand %p989_p13, %p1343_p0 }
 0x248   : > { %p995_p8 = por %p994_p7, %p993_p4 }
 0x249   : > { %p991_p10 = pneg %p990_p6 }
 0x24a   : > { %p997_p1 = por %p996_p11, %p995_p8 }
 0x24c   : > { %p998_p3 = pnand %p997_p1, %p991_p10 }
 0x24e   : > { %1001 = shalt.err (!%p998_p3)
}
 0x24f   : > { %786 = dma.vmem_to_hbm [thread:$0]  (%p1343_p0), %s1282_s6, 64, %s1280_s9, %s603_s11  }
 0x250 PF: > { %s628_s13 = sand.u32 1, %s1032_s18   ;;  %p1344_p5 = scmp.ne.s32.totalorder %s1334_s25, 0 }
 0x251   : > { %p1345_p9 = scmp.ge.s32.totalorder %s1044_s21, 2  ;;  %s629_s7 = scalar_lea.sflag [#allocation4], %s628_s13 }
 0x253   : > { %p800_p12 = pnand %p1345_p9, %p1344_p5 }
 0x255   : > { %1027 = dma.done.wait (!%p800_p12), %s629_s7, 64  }
 0x256   : > { %1029 = vsyncadd (!%p800_p12), %s629_s7, 4294967232  ;;  %p19_p2 = scmp.ge.s32.totalorder %s1195_s16, 4   ;;  %s1346_s18 = smov %s1036_s19 }
 0x257   : > { %s1347_s19 = smov %s1040_s20  ;;  %s1348_s20 = smov %s1204_s27 }
 0x258   : > { %s1349_s21 = smov %s1195_s16  ;;  %21 = sbr.rel (!%p19_p2) target bundleno = 6 (0x6), region = 93 }
 0x25f   :  { %634 = vsyncpa [#allocation3], 1 }
 0x260   :  { %636 = vsyncpa [#allocation3 + $0x1], 1 }
 0x261   :  { %637 = vsyncpa [#allocation6], 1 }
 0x262   :  { %638 = vsyncpa [#allocation4], 1 }
 0x263   :  { %640 = vsyncpa [#allocation4 + $0x1], 1 }

</bundles_post_ra>
